<compile_context>
chip_gen: v6e
topology: v6e:2x2x1
jax: 0.10.0
libtpu: 0.0.40
codegen_flags: <defaults>
</compile_context>

<pallas_src>
import functools

import jax
import jax.numpy as jnp
from jax import lax
from jax.experimental import pallas as pl
from jax.experimental.pallas import tpu as pltpu

LANE = 128     # lane width of a vreg (last dim)


def _round_up(x, m):
    return ((x + m - 1) // m) * m


def _pad2d(x, rows, cols, dtype):
    """Zero-pad a 2D array up to (rows, cols) and cast to dtype."""
    out = jnp.zeros((rows, cols), dtype)
    return out.at[: x.shape[0], : x.shape[1]].set(x.astype(dtype))


def _pick_tile(n_pad):
    """Largest of 512/256/128 that divides n_pad (n_pad is a multiple of 128)."""
    for t in (512, 256, 128):
        if n_pad % t == 0:
            return t
    return 128


# ------------------------------ fused kernel --------------------------------

def _lgnet_kernel(x_ref, a_ref, w_conv_ref, w_out_ref, b_out_ref,
                  probs_ref, h_ref,
                  h_cur, h_nxt, acc,
                  *, n_classes, tm, tk):
    """Whole LGNetwork forward for level 0.

    Grid = (layer, row-tile, K-tile).  Per layer:  h <- ReLU((A @ h) @ W_l).
    On the last layer's finalize:  h_out = ReLU(h @ W_out + b); probs = softmax.

    x_ref      : [Np, 128]     bf16  features (resident, constant index_map)
    a_ref      : [tm, tk]      bf16  streamed tile of the graph operator
    w_conv_ref : [1, 128, 128] bf16  conv weight of the current layer
    w_out_ref  : [128, 128]    bf16  output Linear weight (resident)
    b_out_ref  : [1, 128]      f32   output Linear bias (resident)
    probs_ref  : [tm, 128]     f32   softmax(h) row tile
    h_ref      : [tm, 128]     f32   ReLU(logits) row tile
    h_cur/h_nxt: [Np, 128]     bf16  VMEM scratch carrying h across layers
    acc        : [tm, 128]     f32   K-reduction accumulator for A @ h
    """
    l = pl.program_id(0)          # conv layer index
    i = pl.program_id(1)          # row tile of A / output rows
    k = pl.program_id(2)          # K (column) tile of A == row tile of h_cur
    n_layers = pl.num_programs(0)
    n_k = pl.num_programs(2)

    first_step_of_layer = (i == 0) & (k == 0)

    # Load the input features at the very first step; at later layer boundaries,
    # swap the freshly computed h into the "current" buffer.
    @pl.when(first_step_of_layer & (l == 0))
    def _():
        h_cur[...] = x_ref[...]

    @pl.when(first_step_of_layer & (l > 0))
    def _():
        h_cur[...] = h_nxt[...]

    # K-reduction accumulator init.
    @pl.when(k == 0)
    def _():
        acc[...] = jnp.zeros_like(acc)

    # acc += A[i-tile, k-tile] @ h_cur[k-tile, :]   (bf16 operands, f32 acc)
    k_off = pl.multiple_of(k * tk, tk)
    acc[...] += jnp.dot(a_ref[...], h_cur[pl.ds(k_off, tk), :],
                        preferred_element_type=jnp.float32)

    # Finalize this row tile of the current layer.
    @pl.when(k == n_k - 1)
    def _():
        h_new = jnp.dot(acc[...].astype(jnp.bfloat16), w_conv_ref[0],
                        preferred_element_type=jnp.float32)
        h_new = jnp.maximum(h_new, 0.0)                       # conv activation
        i_off = pl.multiple_of(i * tm, tm)
        h_nxt[pl.ds(i_off, tm), :] = h_new.astype(h_nxt.dtype)

        # Output head (outLayer + ReLU + softmax) only after the last conv layer.
        @pl.when(l == n_layers - 1)
        def _():
            logits = jnp.dot(h_new.astype(jnp.bfloat16), w_out_ref[...],
                             preferred_element_type=jnp.float32) + b_out_ref[...]
            h_out = jnp.maximum(logits, 0.0)
            # Softmax(dim=1) over the first n_classes lanes (rest is zero padding).
            col = lax.broadcasted_iota(jnp.int32, h_out.shape, 1)
            valid = col < n_classes
            m = jnp.max(jnp.where(valid, h_out, -jnp.inf), axis=1, keepdims=True)
            e = jnp.where(valid, jnp.exp(h_out - m), 0.0)
            denom = jnp.sum(e, axis=1, keepdims=True)
            probs_ref[...] = e * pl.reciprocal(denom, approx=True)
            h_ref[...] = h_out


def lgnet_forward_fused(a_pad, x_pad, w_conv_stack, w_out_pad, b_out_pad,
                        *, n_nodes, n_classes):
    """One pallas_call for the whole forward; returns (probs, h) at logical shapes."""
    np_pad = a_pad.shape[0]
    n_layers = int(w_conv_stack.shape[0])
    tm = tk = _pick_tile(np_pad)
    n_row, n_k = np_pad // tm, np_pad // tk

    # Scoped-VMEM budget from the actual resident / double-buffered footprint.
    bf2, f4 = 2, 4
    est = (np_pad * LANE * bf2            # x (resident)
           + 2 * tm * tk * bf2            # A tile (double-buffered)
           + 2 * LANE * LANE * bf2        # per-layer conv weight block
           + 2 * LANE * LANE * bf2        # w_out
           + 2 * 8 * LANE * f4            # b_out (padded to one sublane tile)
           + 2 * 2 * tm * LANE * f4       # two f32 output tiles, double-buffered
           + 2 * np_pad * LANE * bf2      # h_cur + h_nxt scratch
           + tm * LANE * f4)              # K-reduction accumulator
    vmem_limit = int(min(max(2 * est + (1 << 20), 4 << 20), 64 << 20))

    kernel = functools.partial(_lgnet_kernel, n_classes=n_classes, tm=tm, tk=tk)
    probs_p, h_p = pl.pallas_call(
        kernel,
        out_shape=(
            jax.ShapeDtypeStruct((np_pad, LANE), jnp.float32),  # softmax probs
            jax.ShapeDtypeStruct((np_pad, LANE), jnp.float32),  # post-ReLU logits
        ),
        grid_spec=pltpu.PrefetchScalarGridSpec(
            num_scalar_prefetch=0,
            grid=(n_layers, n_row, n_k),
            in_specs=[
                pl.BlockSpec((np_pad, LANE), lambda l, i, k: (0, 0)),      # x
                pl.BlockSpec((tm, tk), lambda l, i, k: (i, k)),            # A tiles
                pl.BlockSpec((1, LANE, LANE), lambda l, i, k: (l, 0, 0)),  # W_l
                pl.BlockSpec((LANE, LANE), lambda l, i, k: (0, 0)),        # W_out
                pl.BlockSpec((1, LANE), lambda l, i, k: (0, 0)),           # b_out
            ],
            out_specs=(
                pl.BlockSpec((tm, LANE), lambda l, i, k: (i, 0)),
                pl.BlockSpec((tm, LANE), lambda l, i, k: (i, 0)),
            ),
            scratch_shapes=[
                pltpu.VMEM((np_pad, LANE), jnp.bfloat16),   # h_cur
                pltpu.VMEM((np_pad, LANE), jnp.bfloat16),   # h_nxt
                pltpu.VMEM((tm, LANE), jnp.float32),        # acc
            ]),
        compiler_params=pltpu.CompilerParams(
            dimension_semantics=("arbitrary", "arbitrary", "arbitrary"),
            vmem_limit_bytes=vmem_limit),
    )(x_pad, a_pad, w_conv_stack, w_out_pad, b_out_pad)
    # Slice padded, lane-dense outputs back to logical shapes (cheap XLA slice).
    return probs_p[:n_nodes, :n_classes], h_p[:n_nodes, :n_classes]


# ------------------------------ model wrapper --------------------------------

class LGNetworkPallas:
    def __init__(self, lg_list, in_feats, h_feats, n_classes, lg_node_list,
                 num_layers, key):
        assert in_feats <= LANE and h_feats <= LANE and n_classes <= LANE, \
            "kernel assumes feature/class dims fit one lane group (<=128)"
        self.lg_list = [a.astype(jnp.float32) for a in lg_list]
        self.lg_node_list = list(lg_node_list)
        self.in_feats = in_feats
        self.h_feats = h_feats
        self.n_classes = n_classes
        self.num_layers = num_layers

        keys = jax.random.split(key, 2 + num_layers + 2)

        # conv layer weights: first maps in_feats->h_feats, the rest h_feats->h_feats.
        w0_scale = 1.0 / jnp.sqrt(jnp.float32(in_feats))
        self.conv_weights = [
            jax.random.uniform(keys[0], (in_feats, h_feats), jnp.float32,
                               -w0_scale, w0_scale)
        ]
        wh_scale = 1.0 / jnp.sqrt(jnp.float32(h_feats))
        for i in range(num_layers):
            self.conv_weights.append(
                jax.random.uniform(keys[1 + i], (h_feats, h_feats), jnp.float32,
                                   -wh_scale, wh_scale))
        # output Linear(h_feats, n_classes)  (nn.Linear default: with bias)
        self.w_out = jax.random.uniform(keys[-2], (h_feats, n_classes), jnp.float32,
                                        -wh_scale, wh_scale)
        self.b_out = jax.random.uniform(keys[-1], (1, n_classes), jnp.float32,
                                        -wh_scale, wh_scale)

        # ---- padded, kernel-ready parameter layouts (built once, bf16 MXU) ----
        self.n0 = self.lg_node_list[0]
        self.n0_pad = _round_up(self.n0, LANE)       # K axis padded to 128 lanes
        # level-0 graph operator, zero-padded, pre-cast to bf16.
        self.a0_pad = _pad2d(self.lg_list[0], self.n0_pad, self.n0_pad, jnp.bfloat16)
        # all conv weights zero-padded to [128,128], bf16, stacked -> [L,128,128]
        self.w_conv_stack = jnp.stack(
            [_pad2d(w, LANE, LANE, jnp.bfloat16) for w in self.conv_weights], axis=0)
        self.w_out_pad = _pad2d(self.w_out, LANE, LANE, jnp.bfloat16)
        self.b_out_pad = _pad2d(self.b_out, 1, LANE, jnp.float32)

    def reset_lg_feats(self, feat_0):
        # Kept for API fidelity with the reference; the fused forward only needs
        # level 0 (the zero-initialized levels are dead compute — see header).
        feat_list = [feat_0.astype(jnp.float32)]
        for i in range(1, len(self.lg_node_list)):
            feat_list.append(jnp.zeros((self.lg_node_list[i], self.in_feats),
                                       jnp.float32))
        return feat_list

    def forward(self, features):
        x_pad = _pad2d(features, self.n0_pad, LANE, jnp.bfloat16)
        probs, h = lgnet_forward_fused(
            self.a0_pad, x_pad, self.w_conv_stack, self.w_out_pad, self.b_out_pad,
            n_nodes=self.n0, n_classes=self.n_classes)
        return probs, h


# ----------------------------------- main ------------------------------------

if __name__ == "__main__":
    key = jax.random.PRNGKey(0)
    k_feat, k_adj, k_params = jax.random.split(key, 3)

    # small line-graph hierarchy: 3 levels with 8 / 16 / 24 nodes
    lg_node_list = [8, 16, 24]
    in_feats, h_feats, n_classes, num_layers = 4, 32, 4, 1

    # deterministic dense "graph operator" per level: row-normalized (A + I)
    lg_list = []
    adj_keys = jax.random.split(k_adj, len(lg_node_list))
    for n, kk in zip(lg_node_list, adj_keys):
        a = (jax.random.uniform(kk, (n, n)) > 0.7).astype(jnp.float32)
        a = a + jnp.eye(n, dtype=jnp.float32)
        a = a / jnp.sum(a, axis=1, keepdims=True)
        lg_list.append(a)

    features = jax.random.normal(k_feat, (lg_node_list[0], in_feats), jnp.float32)

    model = LGNetworkPallas(lg_list, in_feats, h_feats, n_classes, lg_node_list,
                            num_layers, k_params)

    probs, h = model.forward(features)
    probs = jax.block_until_ready(probs)
    h = jax.block_until_ready(h)

    assert probs.shape == (lg_node_list[0], n_classes)
    assert h.shape == (lg_node_list[0], n_classes)
    # softmax rows sum to ~1 (approx-reciprocal + bf16 matmuls => loose tolerance)
    assert bool(jnp.allclose(jnp.sum(probs, axis=1), 1.0, atol=1e-2))
    # probabilities are non-negative
    assert bool(jnp.all(probs >= 0.0))

    print("KERNEL_OK")
</pallas_src>

<mosaic_0001>
module attributes {stable_mosaic.version = 11 : i64} {
  func.func @_lgnet_kernel(%arg0: i32, %arg1: i32, %arg2: i32, %arg3: memref<128x128xbf16, #tpu.memory_space<vmem>>, %arg4: memref<128x128xbf16, #tpu.memory_space<vmem>>, %arg5: memref<1x128x128xbf16, #tpu.memory_space<vmem>>, %arg6: memref<128x128xbf16, #tpu.memory_space<vmem>>, %arg7: memref<1x128xf32, #tpu.memory_space<vmem>>, %arg8: memref<128x128xf32, #tpu.memory_space<vmem>>, %arg9: memref<128x128xf32, #tpu.memory_space<vmem>>, %arg10: memref<128x128xbf16, #tpu.memory_space<vmem>>, %arg11: memref<128x128xbf16, #tpu.memory_space<vmem>>, %arg12: memref<128x128xf32, #tpu.memory_space<vmem>>) attributes {dimension_semantics = [#tpu.dimension_semantics<arbitrary>, #tpu.dimension_semantics<arbitrary>, #tpu.dimension_semantics<arbitrary>], iteration_bounds = array<i64: 2, 1, 1>, scalar_prefetch = 0 : i64, scratch_operands = 3 : i64, tpu.core_type = #tpu.core_type<tc>, window_params = [{pipeline_mode = #tpu.pipeline_mode<synchronous>, transform_indices = @transform_0, window_bounds = array<i64: 128, 128>}, {transform_indices = @transform_1, window_bounds = array<i64: 128, 128>}, {transform_indices = @transform_2, window_bounds = array<i64: 1, 128, 128>}, {pipeline_mode = #tpu.pipeline_mode<synchronous>, transform_indices = @transform_3, window_bounds = array<i64: 128, 128>}, {pipeline_mode = #tpu.pipeline_mode<synchronous>, transform_indices = @transform_4, window_bounds = array<i64: 1, 128>}, {transform_indices = @transform_5, window_bounds = array<i64: 128, 128>}, {transform_indices = @transform_6, window_bounds = array<i64: 128, 128>}]} {
    %c0_i32 = arith.constant 0 : i32
    %0 = arith.cmpi eq, %arg1, %c0_i32 : i32
    %c0_i32_0 = arith.constant 0 : i32
    %1 = arith.cmpi eq, %arg2, %c0_i32_0 : i32
    %2 = arith.andi %0, %1 : i1
    %c0_i32_1 = arith.constant 0 : i32
    %3 = arith.cmpi eq, %arg0, %c0_i32_1 : i32
    %4 = arith.andi %2, %3 : i1
    %5 = arith.extui %4 : i1 to i32
    %c0_i32_2 = arith.constant 0 : i32
    %6 = arith.cmpi ne, %5, %c0_i32_2 : i32
    scf.if %6 {
      %c0_15 = arith.constant 0 : index
      %c0_16 = arith.constant 0 : index
      %26 = vector.load %arg3[%c0_15, %c0_16] : memref<128x128xbf16, #tpu.memory_space<vmem>>, vector<128x128xbf16>
      %c0_17 = arith.constant 0 : index
      %c0_18 = arith.constant 0 : index
      %27 = vector.load %arg10[%c0_17, %c0_18] : memref<128x128xbf16, #tpu.memory_space<vmem>>, vector<128x128xbf16>
      tpu.vector_store %arg10[%c0_17, %c0_18], %26 {strides = array<i32>} : memref<128x128xbf16, #tpu.memory_space<vmem>>, vector<128x128xbf16>,
    } else {
    }
    %c0_i32_3 = arith.constant 0 : i32
    %7 = arith.cmpi sgt, %arg0, %c0_i32_3 : i32
    %8 = arith.andi %2, %7 : i1
    %9 = arith.extui %8 : i1 to i32
    %c0_i32_4 = arith.constant 0 : i32
    %10 = arith.cmpi ne, %9, %c0_i32_4 : i32
    scf.if %10 {
      %c0_15 = arith.constant 0 : index
      %c0_16 = arith.constant 0 : index
      %26 = vector.load %arg11[%c0_15, %c0_16] : memref<128x128xbf16, #tpu.memory_space<vmem>>, vector<128x128xbf16>
      %c0_17 = arith.constant 0 : index
      %c0_18 = arith.constant 0 : index
      %27 = vector.load %arg10[%c0_17, %c0_18] : memref<128x128xbf16, #tpu.memory_space<vmem>>, vector<128x128xbf16>
      tpu.vector_store %arg10[%c0_17, %c0_18], %26 {strides = array<i32>} : memref<128x128xbf16, #tpu.memory_space<vmem>>, vector<128x128xbf16>,
    } else {
    }
    %c0_i32_5 = arith.constant 0 : i32
    %11 = arith.cmpi eq, %arg2, %c0_i32_5 : i32
    %12 = arith.extui %11 : i1 to i32
    %c0_i32_6 = arith.constant 0 : i32
    %13 = arith.cmpi ne, %12, %c0_i32_6 : i32
    scf.if %13 {
      %cst_15 = arith.constant 0.000000e+00 : f32
      %26 = vector.broadcast %cst_15 : f32 to vector<128x128xf32>
      %c0_16 = arith.constant 0 : index
      %c0_17 = arith.constant 0 : index
      %27 = vector.load %arg12[%c0_16, %c0_17] : memref<128x128xf32, #tpu.memory_space<vmem>>, vector<128x128xf32>
      tpu.vector_store %arg12[%c0_16, %c0_17], %26 {strides = array<i32>} : memref<128x128xf32, #tpu.memory_space<vmem>>, vector<128x128xf32>,
    } else {
    }
    %c128_i32 = arith.constant 128 : i32
    %14 = arith.muli %arg2, %c128_i32 : i32
    %15 = tpu.assume_multiple %14, 128 : i32
    %c0 = arith.constant 0 : index
    %c0_7 = arith.constant 0 : index
    %16 = vector.load %arg12[%c0, %c0_7] : memref<128x128xf32, #tpu.memory_space<vmem>>, vector<128x128xf32>
    %c0_8 = arith.constant 0 : index
    %c0_9 = arith.constant 0 : index
    %17 = vector.load %arg4[%c0_8, %c0_9] : memref<128x128xbf16, #tpu.memory_space<vmem>>, vector<128x128xbf16>
    %18 = arith.index_cast %15 : i32 to index
    %c0_10 = arith.constant 0 : index
    %19 = vector.load %arg10[%18, %c0_10] : memref<128x128xbf16, #tpu.memory_space<vmem>>, vector<128x128xbf16>
    %cst = arith.constant dense<0.000000e+00> : vector<128x128xf32>
    %20 = tpu.matmul %17, %19, %cst {dimension_numbers = #tpu.dot_dimension_numbers<[1], [0], [0], [1], [0, 0, 1, 1], [], []>} : vector<128x128xbf16>, vector<128x128xbf16>, vector<128x128xf32> -> vector<128x128xf32>
    %21 = arith.addf %16, %20 : vector<128x128xf32>
    %c0_11 = arith.constant 0 : index
    %c0_12 = arith.constant 0 : index
    %22 = vector.load %arg12[%c0_11, %c0_12] : memref<128x128xf32, #tpu.memory_space<vmem>>, vector<128x128xf32>
    tpu.vector_store %arg12[%c0_11, %c0_12], %21 {strides = array<i32>} : memref<128x128xf32, #tpu.memory_space<vmem>>, vector<128x128xf32>,
    %c0_i32_13 = arith.constant 0 : i32
    %23 = arith.cmpi eq, %arg2, %c0_i32_13 : i32
    %24 = arith.extui %23 : i1 to i32
    %c0_i32_14 = arith.constant 0 : i32
    %25 = arith.cmpi ne, %24, %c0_i32_14 : i32
    scf.if %25 {
      %c0_15 = arith.constant 0 : index
      %c0_16 = arith.constant 0 : index
      %26 = vector.load %arg12[%c0_15, %c0_16] : memref<128x128xf32, #tpu.memory_space<vmem>>, vector<128x128xf32>
      %27 = arith.truncf %26 : vector<128x128xf32> to vector<128x128xbf16>
      %c0_17 = arith.constant 0 : index
      %c0_18 = arith.constant 0 : index
      %c0_19 = arith.constant 0 : index
      %28 = vector.load %arg5[%c0_17, %c0_18, %c0_19] : memref<1x128x128xbf16, #tpu.memory_space<vmem>>, vector<1x128x128xbf16>
      %29 = vector.shape_cast %28 : vector<1x128x128xbf16> to vector<128x128xbf16>
      %cst_20 = arith.constant dense<0.000000e+00> : vector<128x128xf32>
      %30 = tpu.matmul %27, %29, %cst_20 {dimension_numbers = #tpu.dot_dimension_numbers<[1], [0], [0], [1], [0, 0, 1, 1], [], []>} : vector<128x128xbf16>, vector<128x128xbf16>, vector<128x128xf32> -> vector<128x128xf32>
      %cst_21 = arith.constant 0.000000e+00 : f32
      %31 = vector.broadcast %cst_21 : f32 to vector<128x128xf32>
      %32 = arith.maximumf %30, %31 : vector<128x128xf32>
      %c128_i32_22 = arith.constant 128 : i32
      %33 = arith.muli %arg1, %c128_i32_22 : i32
      %34 = tpu.assume_multiple %33, 128 : i32
      %35 = arith.truncf %32 : vector<128x128xf32> to vector<128x128xbf16>
      %36 = arith.index_cast %34 : i32 to index
      %c0_23 = arith.constant 0 : index
      %37 = vector.load %arg11[%36, %c0_23] : memref<128x128xbf16, #tpu.memory_space<vmem>>, vector<128x128xbf16>
      tpu.vector_store %arg11[%36, %c0_23], %35 {strides = array<i32>} : memref<128x128xbf16, #tpu.memory_space<vmem>>, vector<128x128xbf16>,
      %c1_i32 = arith.constant 1 : i32
      %38 = arith.cmpi eq, %arg0, %c1_i32 : i32
      %39 = arith.extui %38 : i1 to i32
      %c0_i32_24 = arith.constant 0 : i32
      %40 = arith.cmpi ne, %39, %c0_i32_24 : i32
      scf.if %40 {
        %41 = arith.truncf %32 : vector<128x128xf32> to vector<128x128xbf16>
        %c0_25 = arith.constant 0 : index
        %c0_26 = arith.constant 0 : index
        %42 = vector.load %arg6[%c0_25, %c0_26] : memref<128x128xbf16, #tpu.memory_space<vmem>>, vector<128x128xbf16>
        %cst_27 = arith.constant dense<0.000000e+00> : vector<128x128xf32>
        %43 = tpu.matmul %41, %42, %cst_27 {dimension_numbers = #tpu.dot_dimension_numbers<[1], [0], [0], [1], [0, 0, 1, 1], [], []>} : vector<128x128xbf16>, vector<128x128xbf16>, vector<128x128xf32> -> vector<128x128xf32>
        %c0_28 = arith.constant 0 : index
        %c0_29 = arith.constant 0 : index
        %44 = vector.load %arg7[%c0_28, %c0_29] : memref<1x128xf32, #tpu.memory_space<vmem>>, vector<1x128xf32>
        %45 = vector.broadcast %44 : vector<1x128xf32> to vector<128x128xf32>
        %46 = arith.addf %43, %45 : vector<128x128xf32>
        %cst_30 = arith.constant 0.000000e+00 : f32
        %47 = vector.broadcast %cst_30 : f32 to vector<128x128xf32>
        %48 = arith.maximumf %46, %47 : vector<128x128xf32>
        %49 = tpu.iota {dimensions = array<i32: 1>} : vector<128x128xi32>
        %c4_i32 = arith.constant 4 : i32
        %50 = vector.broadcast %c4_i32 : i32 to vector<128x128xi32>
        %51 = arith.cmpi slt, %49, %50 : vector<128x128xi32>
        %cst_31 = arith.constant 0xFF800000 : f32
        %52 = vector.broadcast %cst_31 : f32 to vector<128x128xf32>
        %53 = arith.select %51, %48, %52 : vector<128x128xi1>, vector<128x128xf32>
        %cst_32 = arith.constant dense<0xFF800000> : vector<128xf32>
        %54 = vector.multi_reduction <maximumf>, %53, %cst_32 [1] : vector<128x128xf32> to vector<128xf32>
        %55 = vector.shape_cast %54 : vector<128xf32> to vector<128x1xf32>
        %56 = vector.broadcast %55 : vector<128x1xf32> to vector<128x128xf32>
        %57 = arith.subf %48, %56 : vector<128x128xf32>
        %58 = math.exp %57 : vector<128x128xf32>
        %cst_33 = arith.constant 0.000000e+00 : f32
        %59 = vector.broadcast %cst_33 : f32 to vector<128x128xf32>
        %60 = arith.select %51, %58, %59 : vector<128x128xi1>, vector<128x128xf32>
        %cst_34 = arith.constant dense<0.000000e+00> : vector<128xf32>
        %61 = vector.multi_reduction <add>, %60, %cst_34 [1] : vector<128x128xf32> to vector<128xf32>
        %62 = vector.shape_cast %61 : vector<128xf32> to vector<128x1xf32>
        %63 = tpu.reciprocal %62 {approx = true} : vector<128x1xf32> -> vector<128x1xf32>
        %64 = vector.broadcast %63 : vector<128x1xf32> to vector<128x128xf32>
        %65 = arith.mulf %60, %64 : vector<128x128xf32>
        %c0_35 = arith.constant 0 : index
        %c0_36 = arith.constant 0 : index
        %66 = vector.load %arg8[%c0_35, %c0_36] : memref<128x128xf32, #tpu.memory_space<vmem>>, vector<128x128xf32>
        tpu.vector_store %arg8[%c0_35, %c0_36], %65 {strides = array<i32>} : memref<128x128xf32, #tpu.memory_space<vmem>>, vector<128x128xf32>,
        %c0_37 = arith.constant 0 : index
        %c0_38 = arith.constant 0 : index
        %67 = vector.load %arg9[%c0_37, %c0_38] : memref<128x128xf32, #tpu.memory_space<vmem>>, vector<128x128xf32>
        tpu.vector_store %arg9[%c0_37, %c0_38], %48 {strides = array<i32>} : memref<128x128xf32, #tpu.memory_space<vmem>>, vector<128x128xf32>,
      } else {
      }
    } else {
    }
    return
  }
  func.func @transform_0(%arg0: i32, %arg1: i32, %arg2: i32) -> (i32, i32) {
    %c0_i32 = arith.constant 0 : i32
    %c0_i32_0 = arith.constant 0 : i32
    %c0_i32_1 = arith.constant 0 : i32
    return %c0_i32, %c0_i32_0 : i32, i32
  }
  func.func @transform_1(%arg0: i32, %arg1: i32, %arg2: i32) -> (i32, i32) {
    %c0_i32 = arith.constant 0 : i32
    return %arg1, %arg2 : i32, i32
  }
  func.func @transform_2(%arg0: i32, %arg1: i32, %arg2: i32) -> (i32, i32, i32) {
    %c0_i32 = arith.constant 0 : i32
    %c0_i32_0 = arith.constant 0 : i32
    %c0_i32_1 = arith.constant 0 : i32
    return %arg0, %c0_i32, %c0_i32_0 : i32, i32, i32
  }
  func.func @transform_3(%arg0: i32, %arg1: i32, %arg2: i32) -> (i32, i32) {
    %c0_i32 = arith.constant 0 : i32
    %c0_i32_0 = arith.constant 0 : i32
    %c0_i32_1 = arith.constant 0 : i32
    return %c0_i32, %c0_i32_0 : i32, i32
  }
  func.func @transform_4(%arg0: i32, %arg1: i32, %arg2: i32) -> (i32, i32) {
    %c0_i32 = arith.constant 0 : i32
    %c0_i32_0 = arith.constant 0 : i32
    %c0_i32_1 = arith.constant 0 : i32
    return %c0_i32, %c0_i32_0 : i32, i32
  }
  func.func @transform_5(%arg0: i32, %arg1: i32, %arg2: i32) -> (i32, i32) {
    %c0_i32 = arith.constant 0 : i32
    %c0_i32_0 = arith.constant 0 : i32
    return %arg1, %c0_i32 : i32, i32
  }
  func.func @transform_6(%arg0: i32, %arg1: i32, %arg2: i32) -> (i32, i32) {
    %c0_i32 = arith.constant 0 : i32
    %c0_i32_0 = arith.constant 0 : i32
    return %arg1, %c0_i32 : i32, i32
  }
}

</mosaic_0001>

<bundles_post_ra>
// kernel: tpu_custom_call.1
= control target key start
LH: loop header
LB: loop body
LE: loop exit
PB: predicated region body
PF: predicated region fallthrough
CT: control target
= control target key end

     0   :  { %s2751_s0 = inlined_call_operand.hbm [shape: bf16[128,128], index: 0, kind: input, shape index: {}]   ;;  %s2752_s1 = inlined_call_operand.hbm [shape: bf16[128,128], index: 1, kind: input, shape index: {}]   ;;  %s2753_s2 = inlined_call_operand.hbm [shape: bf16[2,128,128], index: 2, kind: input, shape index: {}]   ;;  %s2754_s3 = inlined_call_operand.hbm [shape: bf16[128,128], index: 3, kind: input, shape index: {}]   ;;  %s2755_s4 = inlined_call_operand.vmem [shape: f32[1,128], index: 4, kind: input, shape index: {}]   ;;  %s2756_s5 = inlined_call_operand.hbm [shape: f32[128,128], index: 5, kind: output, shape index: {0}]   ;;  %s2757_s6 = inlined_call_operand.hbm [shape: f32[128,128], index: 6, kind: output, shape index: {1}]  }
   0x1   :  { %2761 = sst [smem:[#allocation21_spill]] %s2751_s0 }
   0x2   :  { %2762 = sst [smem:[#allocation22_spill]] %s2752_s1 }
   0x3   :  { %12 = vsyncpa [#allocation6], 0 }
   0x4   :  { %13 = vsyncpa [#allocation9], 0 }
   0x5   :  { %14 = vsyncpa [#allocation7], 0 }
   0x6   :  { %15 = vsyncpa [#allocation14], 0  ;;  %s2315_s21 = smov 0   ;;  %s2317_s22 = smov 0  }
   0x7   :  { %s2319_s23 = smov 0   ;;  %s2321_s24 = smov 0  }
   0x8   :  { %s2323_s25 = smov 0   ;;  %s2325_s26 = smov 0  }
   0x9 LB: > { %s2344_s27 = sadd.s32 4294967295, %s2268_s26   ;;  %p103_p0 = scmp.ne.s32.totalorder %s2256_s23, %s2252_s22  ;;  %s2268_s26 = sphi %s2325_s26, %s21_s26   ;;  %s2264_s25 = sphi %s2323_s25, %s2781_s25   ;;  %s2260_s24 = sphi %s2321_s24, %s2780_s24   ;;  %s2256_s23 = sphi %s2319_s23, %s2779_s23   ;;  %s2252_s22 = sphi %s2317_s22, %s2778_s22   ;;  %s2248_s21 = sphi %s2315_s21, %s2777_s21  }
   0xa   : > { %p104_p1 = scmp.eq.s32.totalorder %s2268_s26, 0  ;;  %p109_p2 = scmp.ne.s32.totalorder %s2252_s22, %s2248_s21 }
   0xb   : > { %p2758_p3 = scmp.eq.s32.totalorder %s2344_s27, 0  ;;  %p1547_p4 = scmp.ge.s32.totalorder %s2268_s26, 1 }
   0xc   : > { %p105_p5 = por %p104_p1, %p103_p0  ;;  %p214_p6 = scmp.lt.s32.totalorder %s2268_s26, 3 }
   0xd   : > { %p2355_p7 = por %p2758_p3, %p109_p2  ;;  %s2270_s30 = smov [#allocation5]  }
   0xe   : > { %p2359_p8 = pnand %p1547_p4, %p214_p6  ;;  %s226_s7 = sshll.u32 %s2270_s30, 4  ;;  %s227_s7 = int_to_ptr.vmem [resolvable:$true] %s226_s7 }
   0xf   : > { %p1883_p11 = scmp.lt.s32.totalorder %s2268_s26, 2  ;;  %s2055_s10 = scalar_lea.vmem %s227_s7, 1024 }
  0x10   : > { %p1866_p9 = pneg %p2359_p8  ;;  %p2056_p0 = scmp.ne.s32.totalorder %s227_s7, %s2055_s10 }
  0x11   : > { %p2372_p12 = pnand %p1883_p11, %p105_p5  ;;  %p2063_p4 = scmp.lt.s32.totalorder %s227_s7, %s227_s7 }
  0x12   : > { %p2367_p10 = pnand %p1866_p9, %p2758_p3  ;;  %p2064_p6 = scmp.lt.s32.totalorder %s2055_s10, %s2055_s10 }
  0x14   : > { %p2046_p13 = pneg %p2367_p10  ;;  %p2065_p9 = por %p2064_p6, %p2063_p4 }
  0x16   : > { %p2058_p1 = pnand %p2056_p0, %p2046_p13 }
  0x18   : > { %p2059_p2 = pneg %p2058_p1 }
  0x1a   : > { %p2066_p3 = pnand %p2065_p9, %p2059_p2 }
  0x1c   : > { %2069 = shalt.err (!%p2066_p3)
}
  0x1d   : > { %s2759_s11 = smov 64   ;;  %s2760_s12 = smov 4  }
  0x1e   : > { %s2767_s0 = sld [smem:[#allocation21_spill]]  ;;  %s2273_s15 = smov [#allocation8]  }
  0x1f   : > { %s243_s16 = sshll.u32 %s2273_s15, 4  ;;  %s2274_s17 = smov [#allocation11]   ;;  %s244_s16 = int_to_ptr.vmem [resolvable:$true] %s243_s16 }
  0x20   : > { %s256_s18 = sshll.u32 %s2274_s17, 4  ;;  %s2081_s19 = scalar_lea.vmem %s244_s16, 1024  ;;  %s257_s18 = int_to_ptr.vmem [resolvable:$true] %s256_s18 }
  0x21   : > { %p2082_p5 = scmp.ne.s32.totalorder %s244_s16, %s2081_s19  ;;  %p2089_p0 = scmp.lt.s32.totalorder %s244_s16, %s244_s16 }
  0x22   : > { %p2090_p1 = scmp.lt.s32.totalorder %s2081_s19, %s2081_s19 }
  0x23   : > { %p2084_p3 = pnand %p2082_p5, %p2046_p13 }
  0x24   : > { %1869 = dma.hbm_to_vmem [thread:$0]  (!%p2367_p10), %s2767_s0, 1024, %s227_s7, [#allocation6], %s2759_s11, %s2759_s11, %s2760_s12  }
  0x25   : > { %p2085_p11 = pneg %p2084_p3  ;;  %p2091_p2 = por %p2090_p1, %p2089_p0 }
  0x27   : > { %p2092_p4 = pnand %p2091_p2, %p2085_p11 }
  0x29   : > { %2095 = shalt.err (!%p2092_p4)
}
  0x2a   : > { %s2768_s1 = sld [smem:[#allocation22_spill]]  ;;  %s2107_s30 = scalar_lea.vmem %s257_s18, 1024 }
  0x2b   : > { %p2108_p6 = scmp.ne.s32.totalorder %s257_s18, %s2107_s30  ;;  %p2115_p3 = scmp.lt.s32.totalorder %s257_s18, %s257_s18 }
  0x2c   : > { %p2116_p11 = scmp.lt.s32.totalorder %s2107_s30, %s2107_s30 }
  0x2d   : > { %p2110_p9 = pnand %p2108_p6, %p2046_p13 }
  0x2e   : > { %p2117_p0 = por %p2116_p11, %p2115_p3 }
  0x2f   : > { %p2111_p5 = pneg %p2110_p9 }
  0x30   : > { %1872 = dma.hbm_to_vmem [thread:$0]  (!%p2367_p10), %s2768_s1, 1024, %s244_s16, [#allocation9], %s2759_s11, %s2759_s11, %s2760_s12  }
  0x31   : > { %p2118_p1 = pnand %p2117_p0, %p2111_p5 }
  0x33   : > { %2121 = shalt.err (!%p2118_p1)
}
  0x34   : > { %1875 = dma.hbm_to_vmem [thread:$0]  (!%p2367_p10), %s2754_s3, 1024, %s257_s18, [#allocation9], %s2759_s11, %s2759_s11, %s2760_s12  }
  0x35   : > { %s96_s13 = sadd.s32 1, %s2256_s23  ;;  %s40_s14 = sadd.s32 1, %s2264_s25 }
  0x36   : > { %s273_s15 = sand.u32 1, %s2268_s26   ;;  %p42_p13 = scmp.ge.s32.totalorder %s40_s14, 2 }
  0x37   : > { %s275_s8 = sand.u32 1, %s2256_s23   ;;  %s1618_s16 = sshll.u32 %s2264_s25, 10 }
  0x38   : > { %s2783_s14 = smov (%p42_p13, %s40_s14), 0  ;;  %s1552_s17 = sshll.u32 %s275_s8, 6 }
  0x39   : > { %s283_s21 = scalar_lea.hbm %s2753_s2, %s1618_s16  ;;  %s93_s30 = ssub.s32 %s2264_s25, %s2783_s14 }
  0x3a   : > { %p94_p2 = scmp.eq.s32.totalorder %s93_s30, 0  ;;  %s277_s7 = scalar_lea.vmem [#allocation10], %s1552_s17 }
  0x3b   : > { %s284_s10 = sshll.u32 %s277_s7, 4  ;;  %s274_s11 = scalar_lea.sflag [#allocation6], %s273_s15  ;;  %s285_s10 = int_to_ptr.vmem [resolvable:$true] %s284_s10 }
  0x3c   : > { %s2424_s18 = scalar_select %p94_p2, %s2256_s23, %s96_s13  }
  0x3d   : > { %p2124_p10 = pneg %p2372_p12  ;;  %s2135_s12 = scalar_lea.vmem %s285_s10, 1024 }
  0x3e   : > { %p2136_p4 = scmp.ne.s32.totalorder %s285_s10, %s2135_s12  ;;  %s2275_s0 = smov [#allocation10]  }
  0x3f   : > { %s2140_s8 = sshll.u32 %s2275_s0, 4  ;;  %s2141_s8 = int_to_ptr.vmem [resolvable:$false] %s2140_s8 }
  0x40   : > { %p2138_p6 = pnand %p2136_p4, %p2124_p10  ;;  %s2142_s1 = scalar_lea.vmem %s2141_s8, 2048 }
  0x41   : > { %p2143_p5 = scmp.lt.s32.totalorder %s285_s10, %s2141_s8  ;;  %p2144_p3 = scmp.lt.s32.totalorder %s2142_s1, %s2135_s12 }
  0x42   : > { %p2139_p9 = pneg %p2138_p6 }
  0x43   : > { %p2145_p11 = por %p2144_p3, %p2143_p5 }
  0x45   : > { %p2146_p0 = pnand %p2145_p11, %p2139_p9 }
  0x47   : > { %2149 = shalt.err (!%p2146_p0)
}
  0x48   : > { %s2769_s13 = smov 4   ;;  %s2770_s16 = smov 64  }
  0x49   : > { %1879 = dma.hbm_to_vmem [thread:$0]  (!%p2372_p12), %s283_s21, 1024, %s285_s10, %s274_s11, %s2770_s16, %s2770_s16, %s2769_s13  }
  0x4a   : > { %296 = sbr.rel (%p2359_p8) target bundleno = 1179 (0x49b), region = 40  ;;  %p2771_p1 = scmp.eq.s32.totalorder (!%p2359_p8), %s2344_s27, 0 }
  0x4f   : > { %2223 = dma.done.wait (%p2771_p1), [#allocation6], 1024   ;;  %p2772_p13 = pmov %p2771_p1 }
  0x50   : > { %p2773_p2 = pmov %p2771_p1 }
  0x51   : > { %2225 = vsyncadd (%p2772_p13), [#allocation6], 4294966272 }
  0x52   : > { %2227 = dma.done.wait (%p2773_p2), [#allocation9], 1024   ;;  %p2774_p10 = pmov %p2771_p1 }
  0x53   : > { %s306_s0 = sand.u32 1, %s2344_s27   ;;  %s308_s1 = sand.u32 1, %s2252_s22  }
  0x54   : > { %2229 = vsyncadd (%p2774_p10), [#allocation9], 4294966272  ;;  %s1558_s9 = sshll.u32 %s308_s1, 6  ;;  %s307_s29 = scalar_lea.sflag [#allocation6], %s306_s0 }
  0x55   : > { %s2445_s11 = scalar_lea.vmem [#allocation10], %s1558_s9 }
  0x56   : > { %2231 = dma.done.wait (%p2355_p7), %s307_s29, 1024  }
  0x57   : > { %2233 = vsyncadd (%p2355_p7), %s307_s29, 4294966272  ;;  %p2775_p8 = pmov %p2771_p1 }
  0x58   : > { %p2776_p12 = pmov %p2771_p1 }
  0x59   : > { %2235 = dma.done.wait (%p2775_p8), [#allocation9], 1024  }
  0x5a   : > { %2237 = vsyncadd (%p2776_p12), [#allocation9], 4294966272  ;;  %p346_p4 = scmp.eq.s32.totalorder %s2260_s24, 0 }
  0x5b   : > { %v351_v0 = vld [vmem:[#allocation5] sm:$0xff] (%p346_p4)   ;;  %v353_v1 = vld [vmem:[#allocation5 + $0x8] sm:$0xff] (%p346_p4)   ;;  %v355_v2 = vld [vmem:[#allocation5 + $0x10] sm:$0xff] (%p346_p4)  }
  0x5c   : > { %350 = sbr.rel (!%p346_p4) target bundleno = 97 (0x61), region = 60  ;;  %367 = vst [vmem:[#allocation2] sm:$0xff] (%p346_p4), %v351_v0   ;;  %369 = vst [vmem:[#allocation2 + $0x8] sm:$0xff] (%p346_p4), %v353_v1   ;;  %v357_v3 = vld [vmem:[#allocation5 + $0x18] sm:$0xff] (%p346_p4)   ;;  %v359_v4 = vld [vmem:[#allocation5 + $0x20] sm:$0xff] (%p346_p4)  }
  0x5d   : > { %371 = vst [vmem:[#allocation2 + $0x10] sm:$0xff] (%p346_p4), %v355_v2   ;;  %v361_v5 = vld [vmem:[#allocation5 + $0x28] sm:$0xff] (%p346_p4)   ;;  %373 = vst [vmem:[#allocation2 + $0x18] sm:$0xff] (%p346_p4), %v357_v3   ;;  %v363_v6 = vld [vmem:[#allocation5 + $0x30] sm:$0xff] (%p346_p4)  }
  0x5e   : > { %375 = vst [vmem:[#allocation2 + $0x20] sm:$0xff] (%p346_p4), %v359_v4   ;;  %377 = vst [vmem:[#allocation2 + $0x28] sm:$0xff] (%p346_p4), %v361_v5   ;;  %v365_v7 = vld [vmem:[#allocation5 + $0x38] sm:$0xff] (%p346_p4)  }
  0x5f   : > { %379 = vst [vmem:[#allocation2 + $0x30] sm:$0xff] (%p346_p4), %v363_v6   ;;  %381 = vst [vmem:[#allocation2 + $0x38] sm:$0xff] (%p346_p4), %v365_v7  }
  0x61 PF: > { %p383_p7 = scmp.gt.s32.totalorder %s2260_s24, 0 }
  0x62   : > { %v388_v8 = vld [vmem:[#allocation3] sm:$0xff] (%p383_p7)   ;;  %v390_v9 = vld [vmem:[#allocation3 + $0x8] sm:$0xff] (%p383_p7)   ;;  %v392_v10 = vld [vmem:[#allocation3 + $0x10] sm:$0xff] (%p383_p7)  }
  0x63   : > { %387 = sbr.rel (!%p383_p7) target bundleno = 104 (0x68), region = 64  ;;  %404 = vst [vmem:[#allocation2] sm:$0xff] (%p383_p7), %v388_v8   ;;  %406 = vst [vmem:[#allocation2 + $0x8] sm:$0xff] (%p383_p7), %v390_v9   ;;  %v394_v11 = vld [vmem:[#allocation3 + $0x18] sm:$0xff] (%p383_p7)   ;;  %v396_v12 = vld [vmem:[#allocation3 + $0x20] sm:$0xff] (%p383_p7)  }
  0x64   : > { %408 = vst [vmem:[#allocation2 + $0x10] sm:$0xff] (%p383_p7), %v392_v10   ;;  %v398_v13 = vld [vmem:[#allocation3 + $0x28] sm:$0xff] (%p383_p7)   ;;  %410 = vst [vmem:[#allocation2 + $0x18] sm:$0xff] (%p383_p7), %v394_v11   ;;  %v400_v14 = vld [vmem:[#allocation3 + $0x30] sm:$0xff] (%p383_p7)  }
  0x65   : > { %412 = vst [vmem:[#allocation2 + $0x20] sm:$0xff] (%p383_p7), %v396_v12   ;;  %414 = vst [vmem:[#allocation2 + $0x28] sm:$0xff] (%p383_p7), %v398_v13   ;;  %v402_v15 = vld [vmem:[#allocation3 + $0x38] sm:$0xff] (%p383_p7)  }
  0x66   : > { %416 = vst [vmem:[#allocation2 + $0x30] sm:$0xff] (%p383_p7), %v400_v14   ;;  %418 = vst [vmem:[#allocation2 + $0x38] sm:$0xff] (%p383_p7), %v402_v15  }
  0x68 PF: > { %v1956_v20 = vld [vmem:[#allocation8] sm:$0xff]   ;;  %v1964_v23 = vld [vmem:[%s2445_s11 + $0x38] sm:$0xff]   ;;  %v1965_v24 = vld [vmem:[%s2445_s11 + $0x30] sm:$0xff]   ;;  %p1602_p6 = scmp.ne.s32.totalorder %s2260_s24, 1 }
  0x69   : > { %1748 = vmatprep.mubr.bf16.mxu0 %v1956_v20  ;;  %1764 = vmatprep.subr.bf16.mxu1 %v1964_v23  ;;  %v1966_v26 = vld [vmem:[%s2445_s11 + $0x28] sm:$0xff]   ;;  %v1967_v28 = vld [vmem:[%s2445_s11 + $0x20] sm:$0xff]   ;;  %v1968_v29 = vld [vmem:[%s2445_s11 + $0x18] sm:$0xff]  }
  0x6a   : > { %v1954_v25 = vld [vmem:[#allocation2 + $0x8] sm:$0xff]   ;;  %1765 = vmatpush3.bf16.msra.mxu1 %v1964_v23  ;;  %v1955_v27 = vld [vmem:[#allocation2] sm:$0xff]   ;;  %v1958_v31 = vld [vmem:[#allocation8 + $0x10] sm:$0xff]  }
  0x6b   : > { %v1952_v21 = vld [vmem:[#allocation2 + $0x18] sm:$0xff]   ;;  %v1953_v22 = vld [vmem:[#allocation2 + $0x10] sm:$0xff]   ;;  %1766 = vmatprep.subr.bf16.mxu1 %v1965_v24  ;;  %v1957_v30 = vld [vmem:[#allocation8 + $0x8] sm:$0xff]  }
  0x6c   : > { %v1950_v18 = vld [vmem:[#allocation2 + $0x28] sm:$0xff]   ;;  %v1951_v19 = vld [vmem:[#allocation2 + $0x20] sm:$0xff]   ;;  %v1969_v32 = vld [vmem:[%s2445_s11 + $0x10] sm:$0xff]  }
  0x6d   : > { %v1948_v16 = vld [vmem:[#allocation2 + $0x38] sm:$0xff]   ;;  %v1949_v17 = vld [vmem:[#allocation2 + $0x30] sm:$0xff]   ;;  %v1960_v34 = vld [vmem:[#allocation8 + $0x20] sm:$0xff]  }
  0x6e   : > { %1732 = vmatprep.subr.bf16.mxu0 %v1948_v16  ;;  %1767 = vmatpush3.bf16.msra.mxu1 %v1965_v24  ;;  %v1959_v33 = vld [vmem:[#allocation8 + $0x18] sm:$0xff]   ;;  %v1961_v35 = vld [vmem:[#allocation8 + $0x28] sm:$0xff]   ;;  %v1962_v36 = vld [vmem:[#allocation8 + $0x30] sm:$0xff]  }
  0x6f   : > { %1733 = vmatpush3.bf16.msra.mxu0 %v1948_v16  ;;  %1768 = vmatprep.subr.bf16.mxu1 %v1966_v26  ;;  %v1963_v37 = vld [vmem:[#allocation8 + $0x38] sm:$0xff]   ;;  %v1970_v38 = vld [vmem:[%s2445_s11 + $0x8] sm:$0xff]   ;;  %v1971_v39 = vld [vmem:[%s2445_s11] sm:$0xff]  }
  0x70   : > { %1734 = vmatprep.subr.bf16.mxu0 %v1949_v17 }
  0x72   : > { %1769 = vmatpush3.bf16.msra.mxu1 %v1966_v26 }
  0x73   : > { %1735 = vmatpush3.bf16.msra.mxu0 %v1949_v17  ;;  %1770 = vmatprep.subr.bf16.mxu1 %v1967_v28 }
  0x74   : > { %1736 = vmatprep.subr.bf16.mxu0 %v1950_v18 }
  0x76   : > { %1771 = vmatpush3.bf16.msra.mxu1 %v1967_v28 }
  0x77   : > { %1737 = vmatpush3.bf16.msra.mxu0 %v1950_v18  ;;  %1772 = vmatprep.subr.bf16.mxu1 %v1968_v29 }
  0x78   : > { %1738 = vmatprep.subr.bf16.mxu0 %v1951_v19 }
  0x7a   : > { %1773 = vmatpush3.bf16.msra.mxu1 %v1968_v29 }
  0x7b   : > { %1739 = vmatpush3.bf16.msra.mxu0 %v1951_v19  ;;  %1774 = vmatprep.subr.bf16.mxu1 %v1969_v32 }
  0x7c   : > { %1740 = vmatprep.subr.bf16.mxu0 %v1952_v21 }
  0x7e   : > { %1775 = vmatpush3.bf16.msra.mxu1 %v1969_v32 }
  0x7f   : > { %1741 = vmatpush3.bf16.msra.mxu0 %v1952_v21  ;;  %1776 = vmatprep.subr.bf16.mxu1 %v1970_v38 }
  0x80   : > { %1742 = vmatprep.subr.bf16.mxu0 %v1953_v22 }
  0x82   : > { %1777 = vmatpush3.bf16.msra.mxu1 %v1970_v38 }
  0x83   : > { %1743 = vmatpush3.bf16.msra.mxu0 %v1953_v22  ;;  %1778 = vmatprep.subr.bf16.mxu1 %v1971_v39 }
  0x84   : > { %1744 = vmatprep.subr.bf16.mxu0 %v1954_v25 }
  0x86   : > { %1779 = vmatpush3.bf16.msra.mxu1 %v1971_v39 }
  0x87   : > { %1745 = vmatpush3.bf16.msra.mxu0 %v1954_v25 }
  0x88   : > { %1746 = vmatprep.subr.bf16.mxu0 %v1955_v27 }
  0x8b   : > { %1747 = vmatpush3.bf16.msra.mxu0 %v1955_v27 }
  0x8e   : > { %1749 = vmatmul.mubr.bf16.vlgmr.msra.gmra.mxu0 %v1957_v30 }
  0x8f   : > { %1752 = vmatprep.mubr.bf16.mxu0 %v1958_v31 }
  0x96   : > { %1753 = vmatmul.mubr.bf16.gmra.mxu0 %v1959_v33 }
  0x97   : > { %1756 = vmatprep.mubr.bf16.mxu0 %v1960_v34 }
  0x9e   : > { %1757 = vmatmul.mubr.bf16.gmra.mxu0 %v1961_v35 }
  0x9f   : > { %1760 = vmatprep.mubr.bf16.mxu0 %v1962_v36 }
  0xa6   : > { %1761 = vmatmul.mubr.bf16.gmra.mxu0 %v1963_v37 }
 0x14e   : > { %v1750_v40 = vpop.f32.mrf.mxu0 }
 0x150   : > { %v622_v41 = vpop.f32.mrf.mxu0 }
 0x152   : > { %v1751_v42 = vpop.f32.mrf.mxu0 }
 0x153   : > { %v737_v45 = vpack.c.bf16 %v1751_v42, %v1750_v40 }
 0x154   : > { %v625_v43 = vpop.f32.mrf.mxu0 }
 0x155   : > { %v736_v44 = vpack.c.bf16 %v625_v43, %v622_v41 }
 0x156   : > { %v1754_v46 = vpop.f32.mrf.mxu0 }
 0x157   : > { %1780 = vmatprep.mubr.bf16.mxu1 %v736_v44 }
 0x158   : > { %v638_v47 = vpop.f32.mrf.mxu0  ;;  %1781 = vmatmul.mubr.bf16.vlgmr.msra.gmra.mxu1 %v737_v45 }
 0x15a   : > { %v1755_v48 = vpop.f32.mrf.mxu0 }
 0x15b   : > { %v739_v51 = vpack.c.bf16 %v1755_v48, %v1754_v46 }
 0x15c   : > { %v641_v49 = vpop.f32.mrf.mxu0 }
 0x15d   : > { %v738_v50 = vpack.c.bf16 %v641_v49, %v638_v47 }
 0x15e   : > { %v1758_v52 = vpop.f32.mrf.mxu0 }
 0x15f   : > { %1784 = vmatprep.mubr.bf16.mxu1 %v738_v50 }
 0x160   : > { %v654_v53 = vpop.f32.mrf.mxu0  ;;  %1785 = vmatmul.mubr.bf16.gmra.mxu1 %v739_v51 }
 0x162   : > { %v1759_v54 = vpop.f32.mrf.mxu0 }
 0x163   : > { %v741_v57 = vpack.c.bf16 %v1759_v54, %v1758_v52 }
 0x164   : > { %v657_v55 = vpop.f32.mrf.mxu0 }
 0x165   : > { %v740_v56 = vpack.c.bf16 %v657_v55, %v654_v53 }
 0x166   : > { %v1762_v58 = vpop.f32.mrf.mxu0 }
 0x167   : > { %1788 = vmatprep.mubr.bf16.mxu1 %v740_v56 }
 0x168   : > { %v670_v59 = vpop.f32.mrf.mxu0  ;;  %1789 = vmatmul.mubr.bf16.gmra.mxu1 %v741_v57 }
 0x16a   : > { %v1763_v60 = vpop.f32.mrf.mxu0 }
 0x16b   : > { %v743_v63 = vpack.c.bf16 %v1763_v60, %v1762_v58 }
 0x16c   : > { %v673_v61 = vpop.f32.mrf.mxu0 }
 0x16d   : > { %v742_v62 = vpack.c.bf16 %v673_v61, %v670_v59 }
 0x16f   : > { %1792 = vmatprep.mubr.bf16.mxu1 %v742_v62 }
 0x170   : > { %1793 = vmatmul.mubr.bf16.gmra.mxu1 %v743_v63 }
 0x218   : > { %v1782_v0 = vpop.f32.mrf.mxu1 }
 0x219   : > { %v907_v3 = vmax.f32 %v1782_v0, 0.0 }
 0x21a   : > { %v842_v1 = vpop.f32.mrf.mxu1 }
 0x21b   : > { %v905_v6 = vmax.f32 %v842_v1, 0.0 }
 0x21c   : > { %v1783_v2 = vpop.f32.mrf.mxu1 }
 0x21d   : > { %v908_v4 = vmax.f32 %v1783_v2, 0.0 }
 0x21e   : > { %v845_v5 = vpop.f32.mrf.mxu1 }
 0x21f   : > { %v2465_v7 = vpack.c.bf16 %v908_v4, %v907_v3  ;;  %v906_v8 = vmax.f32 %v845_v5, 0.0 }
 0x220   : > { %v1786_v9 = vpop.f32.mrf.mxu1 }
 0x221   : > { %1677 = vst [vmem:[#allocation3 + $0x8] sm:$0xff] %v2465_v7   ;;  %v922_v10 = vpack.c.bf16 %v906_v8, %v905_v6  ;;  %v911_v13 = vmax.f32 %v1786_v9, 0.0 }
 0x222   : > { %v858_v11 = vpop.f32.mrf.mxu1 }
 0x223   : > { %1641 = vst [vmem:[#allocation3] sm:$0xff] %v922_v10   ;;  %v909_v16 = vmax.f32 %v858_v11, 0.0 }
 0x224   : > { %v1787_v12 = vpop.f32.mrf.mxu1 }
 0x225   : > { %v912_v14 = vmax.f32 %v1787_v12, 0.0 }
 0x226   : > { %v861_v15 = vpop.f32.mrf.mxu1 }
 0x227   : > { %v2468_v17 = vpack.c.bf16 %v912_v14, %v911_v13  ;;  %v910_v18 = vmax.f32 %v861_v15, 0.0 }
 0x228   : > { %v1790_v19 = vpop.f32.mrf.mxu1 }
 0x229   : > { %1679 = vst [vmem:[#allocation3 + $0x18] sm:$0xff] %v2468_v17   ;;  %v2471_v20 = vpack.c.bf16 %v910_v18, %v909_v16  ;;  %v915_v23 = vmax.f32 %v1790_v19, 0.0 }
 0x22a   : > { %v874_v21 = vpop.f32.mrf.mxu1 }
 0x22b   : > { %1678 = vst [vmem:[#allocation3 + $0x10] sm:$0xff] %v2471_v20   ;;  %v913_v26 = vmax.f32 %v874_v21, 0.0 }
 0x22c   : > { %v1791_v22 = vpop.f32.mrf.mxu1 }
 0x22d   : > { %v916_v24 = vmax.f32 %v1791_v22, 0.0 }
 0x22e   : > { %v877_v25 = vpop.f32.mrf.mxu1 }
 0x22f   : > { %v927_v27 = vpack.c.bf16 %v916_v24, %v915_v23  ;;  %v914_v28 = vmax.f32 %v877_v25, 0.0 }
 0x230   : > { %v1794_v29 = vpop.f32.mrf.mxu1 }
 0x231   : > { %1681 = vst [vmem:[#allocation3 + $0x28] sm:$0xff] %v927_v27   ;;  %v926_v30 = vpack.c.bf16 %v914_v28, %v913_v26  ;;  %v919_v33 = vmax.f32 %v1794_v29, 0.0 }
 0x232   : > { %v890_v31 = vpop.f32.mrf.mxu1 }
 0x233   : > { %1680 = vst [vmem:[#allocation3 + $0x20] sm:$0xff] %v926_v30   ;;  %v917_v36 = vmax.f32 %v890_v31, 0.0 }
 0x234   : > { %v1795_v32 = vpop.f32.mrf.mxu1 }
 0x235   : > { %v920_v34 = vmax.f32 %v1795_v32, 0.0 }
 0x236   : > { %v893_v35 = vpop.f32.mrf.mxu1 }
 0x237   : > { %v929_v37 = vpack.c.bf16 %v920_v34, %v919_v33  ;;  %v918_v38 = vmax.f32 %v893_v35, 0.0  ;;  %1009 = sbr.rel (%p1602_p6) target bundleno = 1148 (0x47c), region = 76 }
 0x239   : > { %1683 = vst [vmem:[#allocation3 + $0x38] sm:$0xff] %v929_v37   ;;  %v928_v39 = vpack.c.bf16 %v918_v38, %v917_v36 }
 0x23b   : > { %1682 = vst [vmem:[#allocation3 + $0x30] sm:$0xff] %v928_v39  }
 0x23c   : > { %v1972_v40 = vld [vmem:[#allocation11 + $0x38] sm:$0xff]   ;;  %1812 = vmatprep.mubr.bf16.mxu0 %v922_v10  ;;  %1820 = vmatprep.mubr.bf16.mxu1 %v926_v30  ;;  %v1973_v41 = vld [vmem:[#allocation11 + $0x30] sm:$0xff]   ;;  %v1974_v42 = vld [vmem:[#allocation11 + $0x28] sm:$0xff]   ;;  %v1194_v48 = vlaneseq }
 0x23d   : > { %1796 = vmatprep.subr.bf16.mxu0 %v1972_v40  ;;  %1828 = vmatprep.subr.bf16.mxu1 %v1972_v40  ;;  %v1975_v43 = vld [vmem:[#allocation11 + $0x20] sm:$0xff]   ;;  %v1976_v44 = vld [vmem:[#allocation11 + $0x18] sm:$0xff]   ;;  %v1977_v45 = vld [vmem:[#allocation11 + $0x10] sm:$0xff]  }
 0x23e   : > { %1797 = vmatpush3.bf16.msra.mxu0 %v1972_v40  ;;  %1836 = vmatpush3.bf16.msra.mxu1 %v1972_v40  ;;  %v1978_v46 = vld [vmem:[#allocation11 + $0x8] sm:$0xff]   ;;  %v1979_v47 = vld [vmem:[#allocation11] sm:$0xff]   ;;  %v2483_v50 = vand.u32 127, %v1194_v48 }
 0x23f   : > { %1798 = vmatprep.subr.bf16.mxu0 %v1973_v41  ;;  %1829 = vmatprep.subr.bf16.mxu1 %v1973_v41  ;;  %v2481_v49 = vld [vmem:[%s2755_s4] ss:$0 sm:$0xff] }
 0x240   : > { %vm1196_vm0 = vcmp.lt.s32.totalorder %v2483_v50, 4 }
 0x242   : > { %1799 = vmatpush3.bf16.msra.mxu0 %v1973_v41  ;;  %1837 = vmatpush3.bf16.msra.mxu1 %v1973_v41 }
 0x243   : > { %1800 = vmatprep.subr.bf16.mxu0 %v1974_v42  ;;  %1830 = vmatprep.subr.bf16.mxu1 %v1974_v42 }
 0x246   : > { %1801 = vmatpush3.bf16.msra.mxu0 %v1974_v42  ;;  %1838 = vmatpush3.bf16.msra.mxu1 %v1974_v42 }
 0x247   : > { %1802 = vmatprep.subr.bf16.mxu0 %v1975_v43  ;;  %1831 = vmatprep.subr.bf16.mxu1 %v1975_v43 }
 0x24a   : > { %1803 = vmatpush3.bf16.msra.mxu0 %v1975_v43  ;;  %1839 = vmatpush3.bf16.msra.mxu1 %v1975_v43 }
 0x24b   : > { %1804 = vmatprep.subr.bf16.mxu0 %v1976_v44  ;;  %1832 = vmatprep.subr.bf16.mxu1 %v1976_v44 }
 0x24e   : > { %1805 = vmatpush3.bf16.msra.mxu0 %v1976_v44  ;;  %1840 = vmatpush3.bf16.msra.mxu1 %v1976_v44 }
 0x24f   : > { %1806 = vmatprep.subr.bf16.mxu0 %v1977_v45  ;;  %1833 = vmatprep.subr.bf16.mxu1 %v1977_v45 }
 0x252   : > { %1807 = vmatpush3.bf16.msra.mxu0 %v1977_v45  ;;  %1841 = vmatpush3.bf16.msra.mxu1 %v1977_v45 }
 0x253   : > { %1808 = vmatprep.subr.bf16.mxu0 %v1978_v46  ;;  %1834 = vmatprep.subr.bf16.mxu1 %v1978_v46 }
 0x256   : > { %1809 = vmatpush3.bf16.msra.mxu0 %v1978_v46  ;;  %1842 = vmatpush3.bf16.msra.mxu1 %v1978_v46 }
 0x257   : > { %1810 = vmatprep.subr.bf16.mxu0 %v1979_v47  ;;  %1835 = vmatprep.subr.bf16.mxu1 %v1979_v47 }
 0x25a   : > { %1811 = vmatpush3.bf16.msra.mxu0 %v1979_v47  ;;  %1843 = vmatpush3.bf16.msra.mxu1 %v1979_v47 }
 0x25d   : > { %1813 = vmatmul.mubr.bf16.vlgmr.msra.gmra.mxu0 %v2465_v7  ;;  %1821 = vmatmul.mubr.bf16.vlgmr.msra.gmra.mxu1 %v927_v27 }
 0x25e   : > { %1816 = vmatprep.mubr.bf16.mxu0 %v2471_v20  ;;  %1824 = vmatprep.mubr.bf16.mxu1 %v928_v39 }
 0x265   : > { %1817 = vmatmul.mubr.bf16.gmra.mxu0 %v2468_v17  ;;  %1825 = vmatmul.mubr.bf16.gmra.mxu1 %v929_v37 }
 0x31d   : > { %v1814_v51 = vpop.f32.mrf.mxu0  ;;  %v1822_v52 = vpop.f32.mrf.mxu1 }
 0x31e   : > { %v1124_v53 = vadd.f32 %v1814_v51, %v2481_v49  ;;  %v1156_v54 = vadd.f32 %v1822_v52, %v2481_v49 }
 0x31f   : > { %v1115_v55 = vpop.f32.mrf.mxu0  ;;  %v1147_v56 = vpop.f32.mrf.mxu1 }
 0x320   : > { %v2488_v57 = vmax.f32 %v1124_v53, 0.0  ;;  %v2490_v58 = vmax.f32 %v1156_v54, 0.0  ;;  %v1116_v59 = vadd.f32 %v2481_v49, %v1115_v55  ;;  %v1148_v60 = vadd.f32 %v2481_v49, %v1147_v56 }
 0x321   : > { %v1815_v61 = vpop.f32.mrf.mxu0  ;;  %v1823_v62 = vpop.f32.mrf.mxu1 }
 0x322   : > { %1391 = vst [vmem:[#allocation13 + $0x10] sm:$0xff] %v2488_v57  ;;  %1399 = vst [vmem:[#allocation13 + $0x50] sm:$0xff] %v2490_v58  ;;  %v2496_v63 = vmax.f32 %v1116_v59, 0.0  ;;  %v2498_v0 = vmax.f32 %v1148_v60, 0.0  ;;  %v1127_v1 = vadd.f32 %v1815_v61, %v2481_v49  ;;  %v1159_v2 = vadd.f32 %v1823_v62, %v2481_v49 }
 0x323   : > { %v1207_v3 = vsel %vm1196_vm0, %v2490_v58, -inf  ;;  %v1150_v4 = vpop.f32.mrf.mxu1  ;;  %v1199_v5 = vsel %vm1196_vm0, %v2488_v57, -inf  ;;  %v1118_v6 = vpop.f32.mrf.mxu0 }
 0x324   : > { %1389 = vst [vmem:[#allocation13] sm:$0xff] %v2496_v63  ;;  %1397 = vst [vmem:[#allocation13 + $0x40] sm:$0xff] %v2498_v0  ;;  %v2510_v7 = vmax.f32 %v1127_v1, 0.0  ;;  %v2512_v8 = vmax.f32 %v1159_v2, 0.0  ;;  %1233 = vmax.xlane.f32.xlu0 %v1207_v3  ;;  %v1151_v9 = vadd.f32 %v2481_v49, %v1150_v4  ;;  %1217 = vmax.xlane.f32.xlu1 %v1199_v5  ;;  %v1197_v17 = vsel %vm1196_vm0, %v2496_v63, -inf }
 0x325   : > { %v1119_v10 = vadd.f32 %v2481_v49, %v1118_v6  ;;  %v1818_v11 = vpop.f32.mrf.mxu0  ;;  %v1826_v12 = vpop.f32.mrf.mxu1  ;;  %v1205_v32 = vsel %vm1196_vm0, %v2498_v0, -inf }
 0x326   : > { %1392 = vst [vmem:[#allocation13 + $0x18] sm:$0xff] %v2510_v7  ;;  %1400 = vst [vmem:[#allocation13 + $0x58] sm:$0xff] %v2512_v8  ;;  %v2518_v13 = vmax.f32 %v1151_v9, 0.0  ;;  %v1200_v15 = vsel %vm1196_vm0, %v2510_v7, -inf  ;;  %v1140_v16 = vadd.f32 %v1818_v11, %v2481_v49  ;;  %v1172_v19 = vadd.f32 %v1826_v12, %v2481_v49 }
 0x327   : > { %v2520_v14 = vmax.f32 %v1119_v10, 0.0  ;;  %v1131_v18 = vpop.f32.mrf.mxu0  ;;  %v1163_v20 = vpop.f32.mrf.mxu1  ;;  %v1208_v31 = vsel %vm1196_vm0, %v2512_v8, -inf }
 0x328   : > { %1398 = vst [vmem:[#allocation13 + $0x48] sm:$0xff] %v2518_v13  ;;  %1219 = vmax.xlane.f32.xlu1 %v1200_v15  ;;  %v2532_v21 = vmax.f32 %v1140_v16, 0.0  ;;  %1213 = vmax.xlane.f32.xlu0 %v1197_v17  ;;  %v1132_v22 = vadd.f32 %v2481_v49, %v1131_v18  ;;  %v1164_v23 = vadd.f32 %v2481_v49, %v1163_v20  ;;  %v2536_v25 = vmax.f32 %v1172_v19, 0.0 }
 0x329   : > { %1390 = vst [vmem:[#allocation13 + $0x8] sm:$0xff] %v2520_v14  ;;  %v1819_v24 = vpop.f32.mrf.mxu0  ;;  %v1827_v26 = vpop.f32.mrf.mxu1  ;;  %v1206_v41 = vsel %vm1196_vm0, %v2518_v13, -inf  ;;  %v1198_v42 = vsel %vm1196_vm0, %v2520_v14, -inf }
 0x32a   : > { %1395 = vst [vmem:[#allocation13 + $0x30] sm:$0xff] %v2532_v21  ;;  %v2539_v27 = vmax.f32 %v1132_v22, 0.0  ;;  %v1143_v28 = vadd.f32 %v1819_v24, %v2481_v49  ;;  %v2542_v29 = vmax.f32 %v1164_v23, 0.0  ;;  %v1175_v30 = vadd.f32 %v1827_v26, %v2481_v49  ;;  %1403 = vst [vmem:[#allocation13 + $0x70] sm:$0xff] %v2536_v25 }
 0x32b   : > { %v1134_v33 = vpop.f32.mrf.mxu0  ;;  %v1166_v34 = vpop.f32.mrf.mxu1  ;;  %v1203_v44 = vsel %vm1196_vm0, %v2532_v21, -inf  ;;  %v1211_v51 = vsel %vm1196_vm0, %v2536_v25, -inf }
 0x32c   : > { %1393 = vst [vmem:[#allocation13 + $0x20] sm:$0xff] %v2539_v27  ;;  %1235 = vmax.xlane.f32.xlu1 %v1208_v31  ;;  %v2553_v35 = vmax.f32 %v1143_v28, 0.0  ;;  %1229 = vmax.xlane.f32.xlu0 %v1205_v32  ;;  %v1135_v36 = vadd.f32 %v2481_v49, %v1134_v33  ;;  %1401 = vst [vmem:[#allocation13 + $0x60] sm:$0xff] %v2542_v29  ;;  %v2557_v37 = vmax.f32 %v1175_v30, 0.0  ;;  %v1201_v46 = vsel %vm1196_vm0, %v2539_v27, -inf }
 0x32d   : > { %v1167_v38 = vadd.f32 %v2481_v49, %v1166_v34  ;;  %v1209_v48 = vsel %vm1196_vm0, %v2542_v29, -inf }
 0x32e   : > { %1396 = vst [vmem:[#allocation13 + $0x38] sm:$0xff] %v2553_v35  ;;  %v2561_v39 = vmax.f32 %v1135_v36, 0.0  ;;  %1404 = vst [vmem:[#allocation13 + $0x78] sm:$0xff] %v2557_v37  ;;  %v1204_v43 = vsel %vm1196_vm0, %v2553_v35, -inf  ;;  %v1212_v49 = vsel %vm1196_vm0, %v2557_v37, -inf }
 0x32f   : > { %v2564_v40 = vmax.f32 %v1167_v38, 0.0 }
 0x330   : > { %1394 = vst [vmem:[#allocation13 + $0x28] sm:$0xff] %v2561_v39  ;;  %1231 = vmax.xlane.f32.xlu1 %v1206_v41  ;;  %1215 = vmax.xlane.f32.xlu0 %v1198_v42  ;;  %v1202_v45 = vsel %vm1196_vm0, %v2561_v39, -inf }
 0x331   : > { %1402 = vst [vmem:[#allocation13 + $0x68] sm:$0xff] %v2564_v40  ;;  %v1210_v47 = vsel %vm1196_vm0, %v2564_v40, -inf }
 0x334   : > { %1227 = vmax.xlane.f32.xlu1 %v1204_v43  ;;  %1225 = vmax.xlane.f32.xlu0 %v1203_v44 }
 0x338   : > { %1223 = vmax.xlane.f32.xlu1 %v1202_v45  ;;  %1221 = vmax.xlane.f32.xlu0 %v1201_v46 }
 0x33c   : > { %1239 = vmax.xlane.f32.xlu1 %v1210_v47  ;;  %1237 = vmax.xlane.f32.xlu0 %v1209_v48 }
 0x340   : > { %1243 = vmax.xlane.f32.xlu1 %v1212_v49  ;;  %1241 = vmax.xlane.f32.xlu0 %v1211_v51 }
 0x3ad   : > { %v1234_v52 = vpop.xlane.xlu0 %1233  ;;  %v1218_v53 = vpop.xlane.xlu1 %1217 }
 0x3ae   : > { %v1255_v54 = vsub.f32 %v2490_v58, %v1234_v52  ;;  %v1247_v55 = vsub.f32 %v2488_v57, %v1218_v53 }
 0x3b0   : > { %v1265_v56 = vmul.f32 1.442695, %v1247_v55  ;;  %v1281_v59 = vmul.f32 1.442695, %v1255_v54 }
 0x3b1   : > { %v1220_v60 = vpop.xlane.xlu1 %1219  ;;  %v1214_v61 = vpop.xlane.xlu0 %1213 }
 0x3b2   : > { %v1248_v62 = vsub.f32 %v2510_v7, %v1220_v60  ;;  %v1245_v1 = vsub.f32 %v2496_v63, %v1214_v61  ;;  %1980 = vpow2.f32 %v1265_v56 }
 0x3b3   : > { %1982 = vpow2.f32 %v1281_v59 }
 0x3b4   : > { %v1267_v2 = vmul.f32 1.442695, %v1248_v62  ;;  %v1261_v3 = vmul.f32 1.442695, %v1245_v1 }
 0x3b5   : > { %v1236_v4 = vpop.xlane.xlu1 %1235  ;;  %v1230_v5 = vpop.xlane.xlu0 %1229 }
 0x3b6   : > { %1984 = vpow2.f32 %v1267_v2  ;;  %v1256_v6 = vsub.f32 %v2512_v8, %v1236_v4  ;;  %v1253_v58 = vsub.f32 %v2498_v0, %v1230_v5 }
 0x3b7   : > { %1986 = vpow2.f32 %v1261_v3 }
 0x3b8   : > { %v1283_v57 = vmul.f32 1.442695, %v1256_v6  ;;  %v1277_v9 = vmul.f32 1.442695, %v1253_v58 }
 0x3b9   : > { %v1232_v10 = vpop.xlane.xlu1 %1231  ;;  %v1216_v11 = vpop.xlane.xlu0 %1215 }
 0x3ba   : > { %1988 = vpow2.f32 %v1283_v57  ;;  %v1254_v7 = vsub.f32 %v2518_v13, %v1232_v10  ;;  %v1246_v63 = vsub.f32 %v2520_v14, %v1216_v11 }
 0x3bb   : > { %1990 = vpow2.f32 %v1277_v9 }
 0x3bc   : > { %v1263_v12 = vmul.f32 1.442695, %v1246_v63  ;;  %v1279_v15 = vmul.f32 1.442695, %v1254_v7 }
 0x3bd   : > { %v1228_v16 = vpop.xlane.xlu1 %1227  ;;  %v1226_v17 = vpop.xlane.xlu0 %1225 }
 0x3be   : > { %v1252_v18 = vsub.f32 %v2553_v35, %v1228_v16  ;;  %v1251_v8 = vsub.f32 %v2532_v21, %v1226_v17  ;;  %1992 = vpow2.f32 %v1263_v12 }
 0x3bf   : > { %v1981_v0 = vpop.eup %1980  ;;  %1994 = vpow2.f32 %v1279_v15 }
 0x3c0   : > { %v1273_v19 = vmul.f32 1.442695, %v1251_v8  ;;  %v1275_v20 = vmul.f32 1.442695, %v1252_v18  ;;  %v2610_v13 = vsel %vm1196_vm0, %v1981_v0, 0.0  ;;  %v1983_v23 = vpop.eup %1982 }
 0x3c1   : > { %v1224_v22 = vpop.xlane.xlu1 %1223  ;;  %v1222_v14 = vpop.xlane.xlu0 %1221  ;;  %1313 = vadd.xlane.f32.xlu0 %v2610_v13  ;;  %v2622_v33 = vsel %vm1196_vm0, %v1983_v23, 0.0 }
 0x3c2   : > { %v1250_v24 = vsub.f32 %v2561_v39, %v1224_v22  ;;  %v1249_v26 = vsub.f32 %v2539_v27, %v1222_v14  ;;  %1996 = vpow2.f32 %v1273_v19 }
 0x3c3   : > { %v1985_v28 = vpop.eup %1984  ;;  %1998 = vpow2.f32 %v1275_v20 }
 0x3c4   : > { %v1269_v21 = vmul.f32 1.442695, %v1249_v26  ;;  %v2617_v30 = vsel %vm1196_vm0, %v1985_v28, 0.0  ;;  %v1271_v31 = vmul.f32 1.442695, %v1250_v24  ;;  %v1987_v35 = vpop.eup %1986 }
 0x3c5   : > { %1315 = vadd.xlane.f32.xlu1 %v2617_v30  ;;  %v1240_v32 = vpop.xlane.xlu1 %1239  ;;  %v1238_v34 = vpop.xlane.xlu0 %1237  ;;  %1329 = vadd.xlane.f32.xlu0 %v2622_v33  ;;  %v2634_v44 = vsel %vm1196_vm0, %v1987_v35, 0.0 }
 0x3c6   : > { %v1258_v27 = vsub.f32 %v2564_v40, %v1240_v32  ;;  %v1257_v36 = vsub.f32 %v2542_v29, %v1238_v34  ;;  %2000 = vpow2.f32 %v1269_v21 }
 0x3c7   : > { %v1989_v38 = vpop.eup %1988  ;;  %2002 = vpow2.f32 %v1271_v31 }
 0x3c8   : > { %v1285_v39 = vmul.f32 1.442695, %v1257_v36  ;;  %v2629_v41 = vsel %vm1196_vm0, %v1989_v38, 0.0  ;;  %v1287_v42 = vmul.f32 1.442695, %v1258_v27  ;;  %v1991_v45 = vpop.eup %1990 }
 0x3c9   : > { %1331 = vadd.xlane.f32.xlu1 %v2629_v41  ;;  %v1244_v43 = vpop.xlane.xlu1 %1243  ;;  %v1242_v40 = vpop.xlane.xlu0 %1241  ;;  %1309 = vadd.xlane.f32.xlu0 %v2634_v44  ;;  %v2641_v51 = vsel %vm1196_vm0, %v1991_v45, 0.0 }
 0x3ca   : > { %v1260_v29 = vsub.f32 %v2557_v37, %v1244_v43  ;;  %v1259_v46 = vsub.f32 %v2536_v25, %v1242_v40  ;;  %2004 = vpow2.f32 %v1285_v39 }
 0x3cb   : > { %v1993_v47 = vpop.eup %1992  ;;  %2006 = vpow2.f32 %v1287_v42 }
 0x3cc   : > { %v1289_v48 = vmul.f32 1.442695, %v1259_v46  ;;  %v1291_v49 = vmul.f32 1.442695, %v1260_v29  ;;  %v2645_v52 = vsel %vm1196_vm0, %v1993_v47, 0.0  ;;  %v1995_v53 = vpop.eup %1994 }
 0x3cd   : > { %1325 = vadd.xlane.f32.xlu0 %v2641_v51  ;;  %1311 = vadd.xlane.f32.xlu1 %v2645_v52  ;;  %v2651_v37 = vsel %vm1196_vm0, %v1995_v53, 0.0 }
 0x3ce   : > { %2008 = vpow2.f32 %v1289_v48 }
 0x3cf   : > { %v1997_v25 = vpop.eup %1996  ;;  %2010 = vpow2.f32 %v1291_v49 }
 0x3d0   : > { %v2655_v54 = vsel %vm1196_vm0, %v1997_v25, 0.0  ;;  %v1999_v55 = vpop.eup %1998 }
 0x3d1   : > { %1327 = vadd.xlane.f32.xlu1 %v2651_v37  ;;  %1321 = vadd.xlane.f32.xlu0 %v2655_v54  ;;  %v2661_v59 = vsel %vm1196_vm0, %v1999_v55, 0.0 }
 0x3d3   : > { %v2001_v56 = vpop.eup %2000 }
 0x3d4   : > { %v2665_v60 = vsel %vm1196_vm0, %v2001_v56, 0.0  ;;  %v2003_v61 = vpop.eup %2002 }
 0x3d5   : > { %1323 = vadd.xlane.f32.xlu1 %v2661_v59  ;;  %1317 = vadd.xlane.f32.xlu0 %v2665_v60  ;;  %v2671_v1 = vsel %vm1196_vm0, %v2003_v61, 0.0 }
 0x3d7   : > { %v2005_v62 = vpop.eup %2004 }
 0x3d8   : > { %v2675_v2 = vsel %vm1196_vm0, %v2005_v62, 0.0  ;;  %v2007_v3 = vpop.eup %2006 }
 0x3d9   : > { %1319 = vadd.xlane.f32.xlu1 %v2671_v1  ;;  %1333 = vadd.xlane.f32.xlu0 %v2675_v2  ;;  %v2681_v5 = vsel %vm1196_vm0, %v2007_v3, 0.0 }
 0x3db   : > { %v2009_v4 = vpop.eup %2008 }
 0x3dc   : > { %v2685_v6 = vsel %vm1196_vm0, %v2009_v4, 0.0  ;;  %v2011_v58 = vpop.eup %2010 }
 0x3dd   : > { %1335 = vadd.xlane.f32.xlu1 %v2681_v5  ;;  %1337 = vadd.xlane.f32.xlu0 %v2685_v6  ;;  %v2691_v57 = vsel %vm1196_vm0, %v2011_v58, 0.0 }
 0x3e1   : > { %1339 = vadd.xlane.f32.xlu1 %v2691_v57 }
 0x44a   : > { %v1314_v9 = vpop.xlane.xlu0 %1313 }
 0x44b   : > { %2012 = vrcp.f32 %v1314_v9 }
 0x44e   : > { %v1316_v10 = vpop.xlane.xlu1 %1315  ;;  %v1330_v11 = vpop.xlane.xlu0 %1329 }
 0x44f   : > { %2014 = vrcp.f32 %v1316_v10 }
 0x450   : > { %2016 = vrcp.f32 %v1330_v11 }
 0x452   : > { %v1332_v7 = vpop.xlane.xlu1 %1331  ;;  %v1310_v63 = vpop.xlane.xlu0 %1309 }
 0x453   : > { %2018 = vrcp.f32 %v1332_v7 }
 0x454   : > { %2020 = vrcp.f32 %v1310_v63 }
 0x456   : > { %v1312_v12 = vpop.xlane.xlu1 %1311  ;;  %v1326_v15 = vpop.xlane.xlu0 %1325 }
 0x457   : > { %2022 = vrcp.f32 %v1312_v12 }
 0x458   : > { %v2013_v16 = vpop.eup %2012  ;;  %2024 = vrcp.f32 %v1326_v15 }
 0x459   : > { %v1359_v50 = vmul.f32 %v2013_v16, %v2610_v13 }
 0x45a   : > { %v1328_v17 = vpop.xlane.xlu1 %1327  ;;  %v1322_v18 = vpop.xlane.xlu0 %1321 }
 0x45b   : > { %1375 = vst [vmem:[#allocation12 + $0x10] sm:$0xff] %v1359_v50  ;;  %2026 = vrcp.f32 %v1328_v17 }
 0x45c   : > { %v2015_v8 = vpop.eup %2014  ;;  %2028 = vrcp.f32 %v1322_v18 }
 0x45d   : > { %v2017_v0 = vpop.eup %2016  ;;  %v1360_v19 = vmul.f32 %v2015_v8, %v2617_v30 }
 0x45e   : > { %v1367_v20 = vmul.f32 %v2017_v0, %v2622_v33  ;;  %v1324_v22 = vpop.xlane.xlu1 %1323  ;;  %v1318_v14 = vpop.xlane.xlu0 %1317 }
 0x45f   : > { %1376 = vst [vmem:[#allocation12 + $0x18] sm:$0xff] %v1360_v19  ;;  %2030 = vrcp.f32 %v1324_v22 }
 0x460   : > { %v2019_v23 = vpop.eup %2018  ;;  %1383 = vst [vmem:[#allocation12 + $0x50] sm:$0xff] %v1367_v20  ;;  %2032 = vrcp.f32 %v1318_v14 }
 0x461   : > { %v2021_v24 = vpop.eup %2020  ;;  %v1368_v13 = vmul.f32 %v2019_v23, %v2629_v41 }
 0x462   : > { %v1357_v26 = vmul.f32 %v2021_v24, %v2634_v44  ;;  %v1320_v28 = vpop.xlane.xlu1 %1319  ;;  %v1334_v21 = vpop.xlane.xlu0 %1333 }
 0x463   : > { %1384 = vst [vmem:[#allocation12 + $0x58] sm:$0xff] %v1368_v13  ;;  %2034 = vrcp.f32 %v1320_v28 }
 0x464   : > { %1373 = vst [vmem:[#allocation12] sm:$0xff] %v1357_v26  ;;  %v2023_v30 = vpop.eup %2022  ;;  %2036 = vrcp.f32 %v1334_v21 }
 0x465   : > { %v2025_v31 = vpop.eup %2024  ;;  %v1358_v32 = vmul.f32 %v2023_v30, %v2645_v52 }
 0x466   : > { %v1365_v33 = vmul.f32 %v2025_v31, %v2641_v51  ;;  %v1336_v34 = vpop.xlane.xlu1 %1335  ;;  %v1338_v35 = vpop.xlane.xlu0 %1337 }
 0x467   : > { %1374 = vst [vmem:[#allocation12 + $0x8] sm:$0xff] %v1358_v32  ;;  %2038 = vrcp.f32 %v1336_v34 }
 0x468   : > { %v2027_v27 = vpop.eup %2026  ;;  %1381 = vst [vmem:[#allocation12 + $0x40] sm:$0xff] %v1365_v33  ;;  %2040 = vrcp.f32 %v1338_v35 }
 0x469   : > { %v2029_v36 = vpop.eup %2028  ;;  %v1366_v38 = vmul.f32 %v2027_v27, %v2651_v37 }
 0x46a   : > { %v1363_v39 = vmul.f32 %v2029_v36, %v2655_v54  ;;  %v1340_v41 = vpop.xlane.xlu1 %1339 }
 0x46b   : > { %1382 = vst [vmem:[#allocation12 + $0x48] sm:$0xff] %v1366_v38  ;;  %2042 = vrcp.f32 %v1340_v41 }
 0x46c   : > { %v2031_v42 = vpop.eup %2030  ;;  %1379 = vst [vmem:[#allocation12 + $0x30] sm:$0xff] %v1363_v39 }
 0x46d   : > { %v2033_v43 = vpop.eup %2032  ;;  %v1364_v44 = vmul.f32 %v2031_v42, %v2661_v59 }
 0x46e   : > { %v1361_v40 = vmul.f32 %v2033_v43, %v2665_v60 }
 0x46f   : > { %1380 = vst [vmem:[#allocation12 + $0x38] sm:$0xff] %v1364_v44 }
 0x470   : > { %v2035_v45 = vpop.eup %2034  ;;  %1377 = vst [vmem:[#allocation12 + $0x20] sm:$0xff] %v1361_v40 }
 0x471   : > { %v2037_v29 = vpop.eup %2036  ;;  %v1362_v46 = vmul.f32 %v2035_v45, %v2671_v1 }
 0x472   : > { %v1369_v47 = vmul.f32 %v2037_v29, %v2675_v2 }
 0x473   : > { %1378 = vst [vmem:[#allocation12 + $0x28] sm:$0xff] %v1362_v46 }
 0x474   : > { %v2039_v48 = vpop.eup %2038  ;;  %1385 = vst [vmem:[#allocation12 + $0x60] sm:$0xff] %v1369_v47 }
 0x475   : > { %v2041_v49 = vpop.eup %2040  ;;  %v1370_v51 = vmul.f32 %v2039_v48, %v2681_v5 }
 0x476   : > { %v1371_v52 = vmul.f32 %v2041_v49, %v2685_v6 }
 0x477   : > { %1386 = vst [vmem:[#allocation12 + $0x68] sm:$0xff] %v1370_v51 }
 0x478   : > { %v2043_v53 = vpop.eup %2042  ;;  %1387 = vst [vmem:[#allocation12 + $0x70] sm:$0xff] %v1371_v52 }
 0x479   : > { %v1372_v25 = vmul.f32 %v2043_v53, %v2691_v57 }
 0x47b   : > { %1388 = vst [vmem:[#allocation12 + $0x78] sm:$0xff] %v1372_v25 }
 0x47c PF: > { %p1887_p9 = scmp.eq.s32.totalorder %s2344_s27, 1  ;;  %s2276_s12 = smov [#allocation12]  }
 0x47d   : > { %s1414_s15 = sshll.u32 %s2276_s12, 4  ;;  %s1415_s15 = int_to_ptr.vmem [resolvable:$true] %s1414_s15 }
 0x47e   : > { %s2150_s17 = scalar_lea.vmem %s1415_s15, 2048  ;;  %p2157_p0 = scmp.lt.s32.totalorder %s1415_s15, %s1415_s15 }
 0x47f   : > { %p2151_p5 = scmp.ne.s32.totalorder %s1415_s15, %s2150_s17  ;;  %p2158_p1 = scmp.lt.s32.totalorder %s2150_s17, %s2150_s17 }
 0x481   : > { %p2152_p3 = pnand %p2151_p5, %p1887_p9  ;;  %p2159_p13 = por %p2158_p1, %p2157_p0 }
 0x483   : > { %p2153_p11 = pneg %p2152_p3 }
 0x485   : > { %p2160_p2 = pnand %p2159_p13, %p2153_p11 }
 0x487   : > { %2163 = shalt.err (!%p2160_p2)
}
 0x488   : > { %s2277_s19 = smov 128   ;;  %s2278_s20 = smov 8  }
 0x489   : > { %1859 = dma.vmem_to_hbm [thread:$0]  (%p1887_p9), %s1415_s15, 2048, %s2756_s5, [#allocation7], %s2277_s19, %s2277_s19, %s2278_s20  }
 0x48a   : > { %s2279_s7 = smov [#allocation13]  }
 0x48b   : > { %s1430_s10 = sshll.u32 %s2279_s7, 4  ;;  %s1431_s10 = int_to_ptr.vmem [resolvable:$true] %s1430_s10 }
 0x48c   : > { %s2174_s8 = scalar_lea.vmem %s1431_s10, 2048  ;;  %p2181_p4 = scmp.lt.s32.totalorder %s1431_s10, %s1431_s10 }
 0x48d   : > { %p2175_p10 = scmp.ne.s32.totalorder %s1431_s10, %s2174_s8  ;;  %p2182_p7 = scmp.lt.s32.totalorder %s2174_s8, %s2174_s8 }
 0x48f   : > { %p2176_p8 = pnand %p2175_p10, %p1887_p9  ;;  %p2183_p6 = por %p2182_p7, %p2181_p4 }
 0x491   : > { %p2177_p12 = pneg %p2176_p8 }
 0x493   : > { %p2184_p5 = pnand %p2183_p6, %p2177_p12 }
 0x495   : > { %2187 = shalt.err (!%p2184_p5)
}
 0x496   : > { %1861 = dma.vmem_to_hbm [thread:$0]  (%p1887_p9), %s1431_s10, 2048, %s2757_s6, [#allocation14], %s2277_s19, %s2277_s19, %s2278_s20  }
 0x497   : > { %2239 = dma.done.wait (%p1887_p9), [#allocation7], 2048  }
 0x498   : > { %2241 = vsyncadd (%p1887_p9), [#allocation7], 4294965248 }
 0x499   : > { %2243 = dma.done.wait (%p1887_p9), [#allocation14], 2048  }
 0x49a   : > { %2245 = vsyncadd (%p1887_p9), [#allocation14], 4294965248 }
 0x49b PF: > { %s21_s26 = sadd.s32 1, %s2268_s26   ;;  %s2777_s21 = smov %s2252_s22 }
 0x49c   : > { %p18_p3 = scmp.ge.s32.totalorder %s21_s26, 4   ;;  %s2778_s22 = smov %s2256_s23 }
 0x49d   : > { %s2779_s23 = smov %s2424_s18  ;;  %s2780_s24 = smov %s2264_s25 }
 0x49e   : > { %s2781_s25 = smov %s2783_s14  ;;  %20 = sbr.rel (!%p18_p3) target bundleno = 9 (0x9), region = 121 }
 0x4a3   :  { %1450 = vsyncpa [#allocation6], 1 }
 0x4a4   :  { %1452 = vsyncpa [#allocation6 + $0x1], 1 }
 0x4a5   :  { %1453 = vsyncpa [#allocation9], 1 }
 0x4a6   :  { %1454 = vsyncpa [#allocation7], 1 }
 0x4a7   :  { %1456 = vsyncpa [#allocation7 + $0x1], 1 }
 0x4a8   :  { %1457 = vsyncpa [#allocation14], 1 }

</bundles_post_ra>
